<compile_context>
chip_gen: v6e
topology: v6e:2x2x1
jax: 0.10.0
libtpu: 0.0.40
codegen_flags: <defaults>
</compile_context>

<pallas_src>
import functools

import jax
import jax.numpy as jnp
from jax import lax
from jax.experimental import pallas as pl
from jax.experimental.pallas import tpu as pltpu


def _is_v7x():
    """Best-effort detection of a 2-TensorCore (v7x-class) TPU."""
    try:
        kind = jax.devices()[0].device_kind.lower()
    except Exception:
        return False
    return "tpu" in kind and "7" in kind


def _bce_ls_kernel(x_ref, t_ref, o_ref, *, smoothing, n_rows, tile_rows,
                   sub_rows, steps, has_ragged):
    p = pl.program_id(0)          # parallel chunk
    i = pl.program_id(1)          # reduction step within the chunk
    c = o_ref.shape[-1]
    n_sub = tile_rows // sub_rows

    # The (1, 8, C) output block is resident across the inner "arbitrary" axis:
    # zero it on the first step of each chunk.
    @pl.when(i == 0)
    def _():
        o_ref[...] = jnp.zeros_like(o_ref)

    def accumulate(masked):
        acc = jnp.zeros((8, c), jnp.float32)
        for s in range(n_sub):                     # small, statically unrolled loop
            r0 = s * sub_rows                      # static, 8-aligned offset
            x = x_ref[pl.ds(r0, sub_rows), :].astype(jnp.float32)
            t = t_ref[pl.ds(r0, sub_rows), :].astype(jnp.float32)
            # Label smoothing.
            t = t * (1.0 - smoothing) + 0.5 * smoothing
            # Numerically stable binary_cross_entropy_with_logits, per element.
            loss = jnp.maximum(x, 0.0) - x * t + jnp.log1p(jnp.exp(-jnp.abs(x)))
            if masked:
                # Zero rows past the true row count (ragged tail / clamped steps).
                row0 = (p * steps + i) * tile_rows + r0
                rows = row0 + lax.broadcasted_iota(jnp.int32, (sub_rows, 1), 0)
                loss = jnp.where(rows < n_rows, loss, 0.0)
            # (sub_rows, C) -> (8, C): pure VPU vreg adds, no XLU cross-lane reduce.
            acc = acc + loss.reshape(sub_rows // 8, 8, c).sum(axis=0)
        o_ref[...] += acc[None]

    if has_ragged:
        logical = p * steps + i
        overhang = (logical + 1) * tile_rows > n_rows   # only tail / clamped steps

        @pl.when(jnp.logical_not(overhang))
        def _():
            accumulate(masked=False)

        @pl.when(overhang)
        def _():
            accumulate(masked=True)
    else:
        accumulate(masked=False)


def label_smoothing_bce(x, target, *, smoothing=0.1, block_bytes=None,
                        sub_bytes=256 * 1024, num_parallel=None,
                        core_parallel=None):
    """Scalar mean smoothed-BCE-with-logits loss (float32).

    x / target are consumed at their stored dtype (bf16 halves HBM traffic) and
    upcast to f32 inside the kernel.
    """
    assert x.shape == target.shape
    if x.ndim != 2:
        c_last = x.shape[-1] if x.ndim >= 1 else 1
        x = x.reshape(-1, c_last)
        target = target.reshape(-1, c_last)
    n, c = x.shape
    total_elems = n * c

    is_v7 = _is_v7x()
    if num_parallel is None:
        num_parallel = 2 if is_v7 else 1           # >1 chunk only pays off with 2 TCs
    if block_bytes is None:
        # ~2 MiB/input/step fits v5e's 16 MiB scoped VMEM; ~4 MiB amortizes the
        # ~0.35 us per-step overhead against v7x's 3.2 TB/s HBM.
        block_bytes = (4 if is_v7 else 2) * 1024 * 1024
    if core_parallel is None:
        core_parallel = is_v7

    itemsize = max(x.dtype.itemsize, target.dtype.itemsize)
    n_pad8 = pl.cdiv(n, 8) * 8

    # Sub-slab: bound live f32 intermediates to ~sub_bytes (rows multiple of 8).
    sub_rows = max(8, min((sub_bytes // (c * 4)) // 8 * 8, n_pad8))
    # Input block: ~block_bytes per input per grid step, multiple of sub_rows.
    rows_cap = max(sub_rows, (block_bytes // (c * itemsize)) // sub_rows * sub_rows)
    tile_rows = min(rows_cap, pl.cdiv(n, sub_rows) * sub_rows)

    total_blocks = pl.cdiv(n, tile_rows)
    p_chunks = max(1, min(num_parallel, total_blocks))
    steps = pl.cdiv(total_blocks, p_chunks)
    has_ragged = p_chunks * steps * tile_rows > n   # ragged tail and/or clamped steps

    kernel = functools.partial(
        _bce_ls_kernel, smoothing=float(smoothing), n_rows=n,
        tile_rows=tile_rows, sub_rows=sub_rows, steps=steps,
        has_ragged=has_ragged)

    # No jnp.pad HBM round-trip: clamp fully out-of-range steps onto the last valid
    # block; the in-kernel mask zeroes their contribution (and the ragged tail rows).
    last_block = total_blocks - 1

    def in_map(p, i):
        return (jnp.minimum(p * steps + i, last_block), 0)

    in_spec = pl.BlockSpec((tile_rows, c), in_map)

    cost = pl.CostEstimate(
        flops=6 * total_elems,
        transcendentals=2 * total_elems,
        bytes_accessed=(x.size * x.dtype.itemsize
                        + target.size * target.dtype.itemsize
                        + p_chunks * 8 * c * 4),
    )

    # Leading-axis semantics: CORE_PARALLEL shards chunks across v7x's 2 TCs;
    # plain "parallel" elsewhere (near-zero codegen impact but always supported).
    cp_sem = getattr(pltpu, "CORE_PARALLEL", None)
    arb_sem = getattr(pltpu, "ARBITRARY", None)
    if (core_parallel and cp_sem is not None and arb_sem is not None
            and p_chunks >= 2 and p_chunks % 2 == 0):
        dim_sems = (cp_sem, arb_sem)
    else:
        dim_sems = ("parallel", "arbitrary")

    partials = pl.pallas_call(
        kernel,
        out_shape=jax.ShapeDtypeStruct((p_chunks, 8, c), jnp.float32),
        grid_spec=pltpu.PrefetchScalarGridSpec(
            num_scalar_prefetch=0,
            grid=(p_chunks, steps),
            in_specs=[in_spec, in_spec],
            out_specs=pl.BlockSpec((1, 8, c), lambda p, i: (p, 0, 0)),
        ),
        compiler_params=pltpu.CompilerParams(dimension_semantics=dim_sems),
        cost_estimate=cost,
    )(x, target)

    # Tiny cross-chunk / cross-lane finish in plain JAX.
    return jnp.sum(partials, dtype=jnp.float32) / jnp.float32(total_elems)


def _reference(x, target, smoothing=0.1):
    xf = x.astype(jnp.float32)
    t = target.astype(jnp.float32) * (1.0 - smoothing) + 0.5 * smoothing
    loss = jnp.maximum(xf, 0.0) - xf * t + jnp.log1p(jnp.exp(-jnp.abs(xf)))
    return jnp.mean(loss)


if __name__ == "__main__":
    key = jax.random.PRNGKey(0)
    k = jax.random.split(key, 6)

    # Case 1: small, nicely shaped f32 inputs (single block, single step).
    N, C = 64, 256
    x = jax.random.normal(k[0], (N, C), dtype=jnp.float32)
    t = jax.random.bernoulli(k[1], p=0.5, shape=(N, C)).astype(jnp.float32)
    loss = jax.block_until_ready(label_smoothing_bce(x, t))
    ref = _reference(x, t)
    assert jnp.allclose(loss, ref, atol=1e-5, rtol=1e-5), (loss, ref)

    # Case 2: ragged row count + tiny blocks -> multi-step reduction, 2 chunks,
    # clamped out-of-range steps and the tail-only mask, with NO jnp.pad.
    N2, C2 = 200, 128
    x2 = jax.random.normal(k[2], (N2, C2), dtype=jnp.float32)
    t2 = jax.random.bernoulli(k[3], p=0.5, shape=(N2, C2)).astype(jnp.float32)
    loss2 = jax.block_until_ready(
        label_smoothing_bce(x2, t2, block_bytes=16 * 1024, sub_bytes=4 * 1024,
                            num_parallel=2))
    ref2 = _reference(x2, t2)
    assert jnp.allclose(loss2, ref2, atol=1e-5, rtol=1e-5), (loss2, ref2)

    # Case 3: bf16 inputs (half the HBM traffic); the kernel upcasts in VMEM.
    N3, C3 = 96, 256
    x3 = jax.random.normal(k[4], (N3, C3), dtype=jnp.bfloat16)
    t3 = jax.random.bernoulli(k[5], p=0.5, shape=(N3, C3)).astype(jnp.bfloat16)
    loss3 = jax.block_until_ready(label_smoothing_bce(x3, t3))
    ref3 = _reference(x3, t3)
    assert jnp.allclose(loss3, ref3, atol=1e-4, rtol=1e-4), (loss3, ref3)

    print("KERNEL_OK")
</pallas_src>

<mosaic_0001>
module attributes {stable_mosaic.version = 11 : i64} {
  func.func @_bce_ls_kernel(%arg0: i32, %arg1: i32, %arg2: memref<64x256xf32, #tpu.memory_space<vmem>>, %arg3: memref<64x256xf32, #tpu.memory_space<vmem>>, %arg4: memref<1x8x256xf32, #tpu.memory_space<vmem>>) attributes {dimension_semantics = [#tpu.dimension_semantics<parallel>, #tpu.dimension_semantics<arbitrary>], iteration_bounds = array<i64: 1, 1>, scalar_prefetch = 0 : i64, scratch_operands = 0 : i64, tpu.core_type = #tpu.core_type<tc>, window_params = [{transform_indices = @transform_0, window_bounds = array<i64: 64, 256>}, {transform_indices = @transform_1, window_bounds = array<i64: 64, 256>}, {transform_indices = @transform_2, window_bounds = array<i64: 1, 8, 256>}]} {
    %c0_i32 = arith.constant 0 : i32
    %0 = arith.cmpi eq, %arg1, %c0_i32 : i32
    %1 = arith.extui %0 : i1 to i32
    %c0_i32_0 = arith.constant 0 : i32
    %2 = arith.cmpi ne, %1, %c0_i32_0 : i32
    scf.if %2 {
      %cst_15 = arith.constant 0.000000e+00 : f32
      %27 = vector.broadcast %cst_15 : f32 to vector<1x8x256xf32>
      %c0_16 = arith.constant 0 : index
      %c0_17 = arith.constant 0 : index
      %c0_18 = arith.constant 0 : index
      %28 = vector.load %arg4[%c0_16, %c0_17, %c0_18] : memref<1x8x256xf32, #tpu.memory_space<vmem>>, vector<1x8x256xf32>
      tpu.vector_store %arg4[%c0_16, %c0_17, %c0_18], %27 {strides = array<i32>} : memref<1x8x256xf32, #tpu.memory_space<vmem>>, vector<1x8x256xf32>,
    } else {
    }
    %cst = arith.constant 0.000000e+00 : f32
    %3 = vector.broadcast %cst : f32 to vector<8x256xf32>
    %c0 = arith.constant 0 : index
    %c0_1 = arith.constant 0 : index
    %4 = vector.load %arg2[%c0, %c0_1] : memref<64x256xf32, #tpu.memory_space<vmem>>, vector<64x256xf32>
    %c0_2 = arith.constant 0 : index
    %c0_3 = arith.constant 0 : index
    %5 = vector.load %arg3[%c0_2, %c0_3] : memref<64x256xf32, #tpu.memory_space<vmem>>, vector<64x256xf32>
    %cst_4 = arith.constant 0.899999976 : f32
    %6 = vector.broadcast %cst_4 : f32 to vector<64x256xf32>
    %7 = arith.mulf %5, %6 : vector<64x256xf32>
    %cst_5 = arith.constant 5.000000e-02 : f32
    %8 = vector.broadcast %cst_5 : f32 to vector<64x256xf32>
    %9 = arith.addf %7, %8 : vector<64x256xf32>
    %cst_6 = arith.constant 0.000000e+00 : f32
    %10 = vector.broadcast %cst_6 : f32 to vector<64x256xf32>
    %11 = arith.maximumf %4, %10 : vector<64x256xf32>
    %12 = arith.mulf %4, %9 : vector<64x256xf32>
    %13 = arith.subf %11, %12 : vector<64x256xf32>
    %14 = math.absf %4 : vector<64x256xf32>
    %cst_7 = arith.constant 0.000000e+00 : f32
    %15 = vector.broadcast %cst_7 : f32 to vector<64x256xf32>
    %16 = arith.subf %15, %14 : vector<64x256xf32>
    %17 = math.exp %16 : vector<64x256xf32>
    %18 = math.log1p %17 : vector<64x256xf32>
    %19 = arith.addf %13, %18 : vector<64x256xf32>
    %20 = vector.shape_cast %19 : vector<64x256xf32> to vector<8x8x256xf32>
    %cst_8 = arith.constant dense<0.000000e+00> : vector<8x256xf32>
    %21 = vector.multi_reduction <add>, %20, %cst_8 [0] : vector<8x8x256xf32> to vector<8x256xf32>
    %22 = arith.addf %3, %21 : vector<8x256xf32>
    %c0_9 = arith.constant 0 : index
    %c0_10 = arith.constant 0 : index
    %c0_11 = arith.constant 0 : index
    %23 = vector.load %arg4[%c0_9, %c0_10, %c0_11] : memref<1x8x256xf32, #tpu.memory_space<vmem>>, vector<1x8x256xf32>
    %24 = vector.shape_cast %22 : vector<8x256xf32> to vector<1x8x256xf32>
    %25 = arith.addf %23, %24 : vector<1x8x256xf32>
    %c0_12 = arith.constant 0 : index
    %c0_13 = arith.constant 0 : index
    %c0_14 = arith.constant 0 : index
    %26 = vector.load %arg4[%c0_12, %c0_13, %c0_14] : memref<1x8x256xf32, #tpu.memory_space<vmem>>, vector<1x8x256xf32>
    tpu.vector_store %arg4[%c0_12, %c0_13, %c0_14], %25 {strides = array<i32>} : memref<1x8x256xf32, #tpu.memory_space<vmem>>, vector<1x8x256xf32>,
    return
  }
  func.func @transform_0(%arg0: i32, %arg1: i32) -> (i32, i32) {
    %c1_i32 = arith.constant 1 : i32
    %0 = arith.muli %arg0, %c1_i32 : i32
    %1 = arith.addi %0, %arg1 : i32
    %c0_i32 = arith.constant 0 : i32
    %2 = arith.minsi %1, %c0_i32 : i32
    %c0_i32_0 = arith.constant 0 : i32
    %c0_i32_1 = arith.constant 0 : i32
    return %2, %c0_i32_0 : i32, i32
  }
  func.func @transform_1(%arg0: i32, %arg1: i32) -> (i32, i32) {
    %c1_i32 = arith.constant 1 : i32
    %0 = arith.muli %arg0, %c1_i32 : i32
    %1 = arith.addi %0, %arg1 : i32
    %c0_i32 = arith.constant 0 : i32
    %2 = arith.minsi %1, %c0_i32 : i32
    %c0_i32_0 = arith.constant 0 : i32
    %c0_i32_1 = arith.constant 0 : i32
    return %2, %c0_i32_0 : i32, i32
  }
  func.func @transform_2(%arg0: i32, %arg1: i32) -> (i32, i32, i32) {
    %c0_i32 = arith.constant 0 : i32
    %c0_i32_0 = arith.constant 0 : i32
    %c0_i32_1 = arith.constant 0 : i32
    return %arg0, %c0_i32, %c0_i32_0 : i32, i32, i32
  }
}

</mosaic_0001>

<bundles_post_ra>
// kernel: tpu_custom_call.1
= control target key start
LH: loop header
LB: loop body
LE: loop exit
PB: predicated region body
PF: predicated region fallthrough
CT: control target
= control target key end

     0   :  { %7 = vsyncpa [#allocation3], 0  ;;  %s872_s0 = inlined_call_operand.hbm [shape: f32[64,256], index: 0, kind: input, shape index: {}]   ;;  %s873_s1 = inlined_call_operand.hbm [shape: f32[64,256], index: 1, kind: input, shape index: {}]   ;;  %s874_s2 = inlined_call_operand.hbm [shape: f32[1,8,256], index: 2, kind: output, shape index: {}]  }
   0x1   :  { %8 = vsyncpa [#allocation6], 0 }
   0x2   :  { %9 = vsyncpa [#allocation4], 0  ;;  %s582_s9 = smov [#allocation2]  }
   0x3   :  { %s22_s10 = sshll.u32 %s582_s9, 4  ;;  %s23_s10 = int_to_ptr.vmem [resolvable:$true] %s22_s10 }
   0x4   :  { %s524_s11 = scalar_lea.vmem %s23_s10, 2048  ;;  %p529_p1 = scmp.lt.s32.totalorder %s23_s10, %s23_s10 }
   0x5   :  { %p525_p0 = scmp.ne.s32.totalorder %s23_s10, %s524_s11  ;;  %p530_p2 = scmp.lt.s32.totalorder %s524_s11, %s524_s11 }
   0x7   :  { %p531_p3 = por %p530_p2, %p529_p1 }
   0x9   :  { %p532_p4 = pnand %p531_p3, %p525_p0 }
   0xb   :  { %535 = shalt.err (!%p532_p4)
}
   0xc   :  { %s583_s12 = smov 256   ;;  %s584_s13 = smov 16  }
   0xd   :  { %28 = dma.hbm_to_vmem [thread:$0]  %s872_s0, 2048, %s23_s10, [#allocation3], %s583_s12, %s583_s12, %s584_s13  }
   0xe   :  { %s585_s16 = smov [#allocation5]  }
   0xf   :  { %s41_s17 = sshll.u32 %s585_s16, 4  ;;  %s42_s17 = int_to_ptr.vmem [resolvable:$true] %s41_s17 }
  0x10   :  { %s544_s18 = scalar_lea.vmem %s42_s17, 2048  ;;  %p549_p6 = scmp.lt.s32.totalorder %s42_s17, %s42_s17 }
  0x11   :  { %p545_p5 = scmp.ne.s32.totalorder %s42_s17, %s544_s18  ;;  %p550_p7 = scmp.lt.s32.totalorder %s544_s18, %s544_s18 }
  0x13   :  { %p551_p8 = por %p550_p7, %p549_p6 }
  0x15   :  { %p552_p9 = pnand %p551_p8, %p545_p5 }
  0x17   :  { %555 = shalt.err (!%p552_p9)
}
  0x18   :  { %47 = dma.hbm_to_vmem [thread:$0]  %s873_s1, 2048, %s42_s17, [#allocation6], %s583_s12, %s583_s12, %s584_s13  }
  0x19   :  { %576 = dma.done.wait [#allocation3], 2048  }
  0x1a   :  { %577 = vsyncadd [#allocation3], 4294965248 }
  0x1b   :  { %578 = dma.done.wait [#allocation6], 2048  }
  0x1c   :  { %579 = vsyncadd [#allocation6], 4294965248  ;;  %v608_v0 = vld [vmem:[#allocation2] sm:$0xff]  ;;  %v610_v1 = vld [vmem:[#allocation2 + $0x10] sm:$0xff]  ;;  %s586_s0 = smov [#allocation7]  }
  0x1d   :  { %v612_v2 = vld [vmem:[#allocation2 + $0x20] sm:$0xff]  ;;  %v614_v3 = vld [vmem:[#allocation2 + $0x30] sm:$0xff]  ;;  %v180_v10 = vand.u32 2147483647, %v608_v0  ;;  %v182_v11 = vand.u32 2147483647, %v610_v1 }
  0x1e   :  { %v616_v4 = vld [vmem:[#allocation2 + $0x40] sm:$0xff]  ;;  %v618_v5 = vld [vmem:[#allocation2 + $0x50] sm:$0xff]  ;;  %v184_v12 = vand.u32 2147483647, %v612_v2  ;;  %v186_v13 = vand.u32 2147483647, %v614_v3 }
  0x1f   :  { %v620_v6 = vld [vmem:[#allocation2 + $0x60] sm:$0xff]  ;;  %v622_v7 = vld [vmem:[#allocation2 + $0x70] sm:$0xff]  ;;  %v188_v15 = vand.u32 2147483647, %v616_v4  ;;  %v190_v16 = vand.u32 2147483647, %v618_v5 }
  0x20   :  { %v84_v8 = vld [vmem:[#allocation5] sm:$0xff]  ;;  %v86_v9 = vld [vmem:[#allocation5 + $0x10] sm:$0xff]  ;;  %v192_v17 = vand.u32 2147483647, %v620_v6  ;;  %v196_v21 = vsub.f32 0.0, %v180_v10  ;;  %v198_v22 = vsub.f32 0.0, %v182_v11 }
  0x21   :  { %v88_v14 = vld [vmem:[#allocation5 + $0x20] sm:$0xff]  ;;  %v90_v18 = vld [vmem:[#allocation5 + $0x30] sm:$0xff]  ;;  %v100_v20 = vmul.f32 0.9, %v84_v8  ;;  %v200_v23 = vsub.f32 0.0, %v184_v12  ;;  %v202_v26 = vsub.f32 0.0, %v186_v13 }
  0x22   :  { %v92_v19 = vld [vmem:[#allocation5 + $0x40] sm:$0xff]  ;;  %v102_v24 = vmul.f32 0.9, %v86_v9  ;;  %v194_v25 = vand.u32 2147483647, %v622_v7  ;;  %v204_v27 = vsub.f32 0.0, %v188_v15 }
  0x23   :  { %v94_v28 = vld [vmem:[#allocation5 + $0x50] sm:$0xff]  ;;  %v206_v29 = vsub.f32 0.0, %v190_v16  ;;  %v212_v30 = vmul.f32 1.442695, %v196_v21  ;;  %v216_v31 = vmul.f32 1.442695, %v198_v22 }
  0x24   :  { %v96_v32 = vld [vmem:[#allocation5 + $0x60] sm:$0xff]  ;;  %v208_v33 = vsub.f32 0.0, %v192_v17  ;;  %v220_v34 = vmul.f32 1.442695, %v200_v23  ;;  %v224_v35 = vmul.f32 1.442695, %v202_v26 }
  0x25   :  { %v98_v36 = vld [vmem:[#allocation5 + $0x70] sm:$0xff]  ;;  %v104_v37 = vmul.f32 0.9, %v88_v14  ;;  %452 = vpow2.f32 %v212_v30  ;;  %v228_v38 = vmul.f32 1.442695, %v204_v27  ;;  %v210_v41 = vsub.f32 0.0, %v194_v25 }
  0x26   :  { %v106_v39 = vmul.f32 0.9, %v90_v18  ;;  %v108_v40 = vmul.f32 0.9, %v92_v19  ;;  %454 = vpow2.f32 %v216_v31  ;;  %v110_v42 = vmul.f32 0.9, %v94_v28 }
  0x27   :  { %v112_v43 = vmul.f32 0.9, %v96_v32  ;;  %456 = vpow2.f32 %v220_v34  ;;  %v232_v44 = vmul.f32 1.442695, %v206_v29  ;;  %v114_v45 = vmul.f32 0.9, %v98_v36 }
  0x28   :  { %458 = vpow2.f32 %v224_v35  ;;  %v236_v46 = vmul.f32 1.442695, %v208_v33  ;;  %v116_v47 = vadd.f32 0.05, %v100_v20  ;;  %v118_v48 = vadd.f32 0.05, %v102_v24 }
  0x29   :  { %v120_v49 = vadd.f32 0.05, %v104_v37  ;;  %460 = vpow2.f32 %v228_v38  ;;  %v122_v50 = vadd.f32 0.05, %v106_v39  ;;  %v124_v51 = vadd.f32 0.05, %v108_v40 }
  0x2a   :  { %v240_v52 = vmul.f32 1.442695, %v210_v41  ;;  %v126_v53 = vadd.f32 0.05, %v110_v42  ;;  %v128_v54 = vadd.f32 0.05, %v112_v43  ;;  %462 = vpow2.f32 %v232_v44 }
  0x2b   :  { %v132_v55 = vmax.f32 %v608_v0, 0.0  ;;  %v134_v56 = vmax.f32 %v610_v1, 0.0  ;;  %v136_v57 = vmax.f32 %v612_v2, 0.0  ;;  %v138_v58 = vmax.f32 %v614_v3, 0.0  ;;  %v85_v14 = vld [vmem:[#allocation5 + $0x8] sm:$0xff]  ;;  %v668_v22 = vld [vmem:[#allocation2 + $0x38] sm:$0xff] }
  0x2c   :  { %464 = vpow2.f32 %v236_v46  ;;  %v130_v59 = vadd.f32 0.05, %v114_v45  ;;  %v140_v60 = vmax.f32 %v616_v4, 0.0  ;;  %v148_v61 = vmul.f32 %v116_v47, %v608_v0  ;;  %v670_v23 = vld [vmem:[#allocation2 + $0x48] sm:$0xff]  ;;  %v676_v33 = vld [vmem:[#allocation2 + $0x58] sm:$0xff]  ;;  %s432_s1 = sshll.u32 %s586_s0, 4  ;;  %s433_s1 = int_to_ptr.vmem [resolvable:$true] %s432_s1 }
  0x2d   :  { %v150_v62 = vmul.f32 %v118_v48, %v610_v1  ;;  %v152_v63 = vmul.f32 %v120_v49, %v612_v2  ;;  %v154_v8 = vmul.f32 %v122_v50, %v614_v3  ;;  %v156_v9 = vmul.f32 %v124_v51, %v616_v4  ;;  %v650_v2 = vld [vmem:[#allocation2 + $0x8] sm:$0xff]  ;;  %v652_v3 = vld [vmem:[#allocation2 + $0x18] sm:$0xff]  ;;  %s556_s21 = scalar_lea.vmem %s433_s1, 256  ;;  %p561_p11 = scmp.lt.s32.totalorder %s433_s1, %s433_s1 }
  0x2e   :  { %466 = vpow2.f32 %v240_v52  ;;  %v142_v10 = vmax.f32 %v618_v5, 0.0  ;;  %v144_v11 = vmax.f32 %v620_v6, 0.0  ;;  %v158_v12 = vmul.f32 %v126_v53, %v618_v5  ;;  %v678_v34 = vld [vmem:[#allocation2 + $0x68] sm:$0xff]  ;;  %p557_p10 = scmp.ne.s32.totalorder %s433_s1, %s556_s21  ;;  %p562_p12 = scmp.lt.s32.totalorder %s556_s21, %s556_s21 }
  0x2f   :  { %v160_v13 = vmul.f32 %v128_v54, %v620_v6  ;;  %v146_v0 = vmax.f32 %v622_v7, 0.0  ;;  %v162_v1 = vmul.f32 %v130_v59, %v622_v7  ;;  %v648_v15 = vsub.f32 %v132_v55, %v148_v61  ;;  %v662_v6 = vld [vmem:[#allocation2 + $0x28] sm:$0xff] }
  0x30   :  { %v654_v16 = vsub.f32 %v134_v56, %v150_v62  ;;  %v656_v17 = vsub.f32 %v136_v57, %v152_v63  ;;  %v658_v18 = vsub.f32 %v138_v58, %v154_v8  ;;  %v660_v5 = vsub.f32 %v140_v60, %v156_v9  ;;  %p563_p13 = por %p562_p12, %p561_p11 }
  0x31   :  { %v664_v20 = vsub.f32 %v142_v10, %v158_v12  ;;  %v666_v7 = vsub.f32 %v144_v11, %v160_v13  ;;  %v672_v24 = vmul.f32 0.9, %v85_v14  ;;  %v181_v28 = vand.u32 2147483647, %v650_v2  ;;  %v701_v12 = vld [vmem:[#allocation2 + $0x78] sm:$0xff] }
  0x32   :  { %v453_v4 = vpop.eup %452  ;;  %v183_v29 = vand.u32 2147483647, %v652_v3  ;;  %v185_v35 = vand.u32 2147483647, %v662_v6  ;;  %v187_v39 = vand.u32 2147483647, %v668_v22  ;;  %v687_v52 = vsub.f32 %v146_v0, %v162_v1  ;;  %p564_p0 = pnand %p563_p13, %p557_p10 }
  0x33   :  { %v455_v19 = vpop.eup %454  ;;  %v244_v21 = vadd.f32 1.0, %v453_v4  ;;  %v247_v26 = vmul.f32 -0.5, %v453_v4  ;;  %v250_v37 = vand.u32 2147483647, %v453_v4  ;;  %v189_v42 = vand.u32 2147483647, %v670_v23 }
  0x34   :  { %v457_v25 = vpop.eup %456  ;;  %v262_v27 = vadd.f32 1.0, %v455_v19  ;;  %v265_v31 = vmul.f32 -0.5, %v455_v19  ;;  %v268_v40 = vand.u32 2147483647, %v455_v19  ;;  %v191_v46 = vand.u32 2147483647, %v676_v33 }
  0x35   :  { %v459_v30 = vpop.eup %458  ;;  %468 = vlog2.f32 %v244_v21  ;;  %v280_v32 = vadd.f32 1.0, %v457_v25  ;;  %v283_v38 = vmul.f32 -0.5, %v457_v25  ;;  %v248_v44 = vadd.f32 1.0, %v247_v26 }
  0x36   :  { %v461_v36 = vpop.eup %460  ;;  %470 = vlog2.f32 %v262_v27  ;;  %v298_v41 = vadd.f32 1.0, %v459_v30  ;;  %v301_v45 = vmul.f32 -0.5, %v459_v30  ;;  %v193_v47 = vand.u32 2147483647, %v678_v34 }
  0x37   :  { %472 = vlog2.f32 %v280_v32  ;;  %v463_v43 = vpop.eup %462  ;;  %v266_v49 = vadd.f32 1.0, %v265_v31  ;;  %v316_v50 = vadd.f32 1.0, %v461_v36  ;;  %v319_v51 = vmul.f32 -0.5, %v461_v36 }
  0x38   :  { %474 = vlog2.f32 %v298_v41  ;;  %vm689_vm0 = vcmp.lt.f32.partialorder %v250_v37, 0.0004427343  ;;  %v284_v54 = vadd.f32 1.0, %v283_v38  ;;  %v286_v55 = vand.u32 2147483647, %v457_v25 }
  0x39   :  { %v685_v48 = vpop.eup %464  ;;  %vm695_vm1 = vcmp.lt.f32.partialorder %v268_v40, 0.0004427343  ;;  %v302_v58 = vadd.f32 1.0, %v301_v45  ;;  %v304_v59 = vand.u32 2147483647, %v459_v30  ;;  %476 = vlog2.f32 %v316_v50 }
  0x3a   :  { %v334_v60 = vadd.f32 1.0, %v463_v43  ;;  %v249_v61 = vmul.f32 %v453_v4, %v248_v44  ;;  %v322_v62 = vand.u32 2147483647, %v461_v36  ;;  %v337_v63 = vmul.f32 -0.5, %v463_v43 }
  0x3b   :  { %v693_v56 = vpop.eup %466  ;;  %v352_v8 = vadd.f32 1.0, %v685_v48  ;;  %v267_v9 = vmul.f32 %v455_v19, %v266_v49  ;;  %v320_v10 = vadd.f32 1.0, %v319_v51  ;;  %v355_v11 = vmul.f32 -0.5, %v685_v48 }
  0x3c   :  { %478 = vlog2.f32 %v334_v60  ;;  %vm703_vm2 = vcmp.lt.f32.partialorder %v286_v55, 0.0004427343  ;;  %v340_v14 = vand.u32 2147483647, %v463_v43  ;;  %v370_v0 = vadd.f32 1.0, %v693_v56 }
  0x3d   :  { %480 = vlog2.f32 %v352_v8  ;;  %v285_v1 = vmul.f32 %v457_v25, %v284_v54  ;;  %v303_v4 = vmul.f32 %v459_v30, %v302_v58  ;;  %vm708_vm3 = vcmp.lt.f32.partialorder %v304_v59, 0.0004427343 }
  0x3e   :  { %v358_v19 = vand.u32 2147483647, %v685_v48  ;;  %vm713_vm4 = vcmp.lt.f32.partialorder %v322_v62, 0.0004427343  ;;  %v338_v27 = vadd.f32 1.0, %v337_v63  ;;  %482 = vlog2.f32 %v370_v0 }
  0x3f   :  { %v195_v31 = vand.u32 2147483647, %v701_v12  ;;  %v197_v32 = vsub.f32 0.0, %v181_v28  ;;  %v321_v37 = vmul.f32 %v461_v36, %v320_v10  ;;  %v356_v38 = vadd.f32 1.0, %v355_v11 }
  0x40   :  { %v373_v25 = vmul.f32 -0.5, %v693_v56  ;;  %v199_v30 = vsub.f32 0.0, %v183_v29  ;;  %vm719_vm5 = vcmp.lt.f32.partialorder %v340_v14, 0.0004427343  ;;  %v376_v44 = vand.u32 2147483647, %v693_v56 }
  0x41   :  { %v201_v45 = vsub.f32 0.0, %v185_v35  ;;  %v203_v49 = vsub.f32 0.0, %v187_v39  ;;  %v205_v50 = vsub.f32 0.0, %v189_v42  ;;  %vm724_vm6 = vcmp.lt.f32.partialorder %v358_v19, 0.0004427343 }
  0x42   :  { %v469_v40 = vpop.eup %468  ;;  %v207_v28 = vsub.f32 0.0, %v191_v46  ;;  %v209_v36 = vsub.f32 0.0, %v193_v47  ;;  %v211_v58 = vsub.f32 0.0, %v195_v31  ;;  %v339_v60 = vmul.f32 %v463_v43, %v338_v27 }
  0x43   :  { %v471_v51 = vpop.eup %470  ;;  %v246_v54 = vmul.f32 0.6931472, %v469_v40  ;;  %v214_v62 = vmul.f32 1.442695, %v197_v32  ;;  %v218_v63 = vmul.f32 1.442695, %v199_v30  ;;  %v357_v13 = vmul.f32 %v685_v48, %v356_v38 }
  0x44   :  { %v473_v29 = vpop.eup %472  ;;  %v264_v59 = vmul.f32 0.6931472, %v471_v51  ;;  %v222_v39 = vmul.f32 1.442695, %v201_v45  ;;  %v226_v42 = vmul.f32 1.442695, %v203_v49 }
  0x45   :  { %v252_v8 = vsel %vm689_vm0, %v249_v61, %v246_v54  ;;  %v282_v35 = vmul.f32 0.6931472, %v473_v29  ;;  %v475_v10 = vpop.eup %474  ;;  %484 = vpow2.f32 %v214_v62  ;;  %v230_v46 = vmul.f32 1.442695, %v205_v50  ;;  %v87_v32 = vld [vmem:[#allocation5 + $0x18] sm:$0xff]  ;;  %v89_v50 = vld [vmem:[#allocation5 + $0x28] sm:$0xff] }
  0x46   :  { %v270_v11 = vsel %vm695_vm1, %v267_v9, %v264_v59  ;;  %v388_v14 = vadd.f32 %v252_v8, %v648_v15  ;;  %v300_v43 = vmul.f32 0.6931472, %v475_v10  ;;  %486 = vpow2.f32 %v218_v63  ;;  %v477_v53 = vpop.eup %476  ;;  %v93_v51 = vld [vmem:[#allocation5 + $0x48] sm:$0xff] }
  0x47   :  { %v288_v47 = vsel %vm703_vm2, %v285_v1, %v282_v35  ;;  %v390_v0 = vadd.f32 %v270_v11, %v654_v16  ;;  %v374_v61 = vadd.f32 1.0, %v373_v25  ;;  %488 = vpow2.f32 %v222_v39 }
  0x48   :  { %v392_v19 = vadd.f32 %v288_v47, %v656_v17  ;;  %v234_v27 = vmul.f32 1.442695, %v207_v28  ;;  %v306_v57 = vsel %vm708_vm3, %v303_v4, %v300_v43  ;;  %v318_v9 = vmul.f32 0.6931472, %v477_v53 }
  0x49   :  { %v404_v15 = vadd.f32 %v390_v0, %v388_v14  ;;  %490 = vpow2.f32 %v226_v42  ;;  %v479_v31 = vpop.eup %478  ;;  %v394_v1 = vadd.f32 %v306_v57, %v658_v18  ;;  %v238_v16 = vmul.f32 1.442695, %v209_v36  ;;  %v95_v36 = vld [vmem:[#allocation5 + $0x58] sm:$0xff] }
  0x4a   :  { %492 = vpow2.f32 %v230_v46  ;;  %v481_v30 = vpop.eup %480  ;;  %v324_v17 = vsel %vm713_vm4, %v321_v37, %v318_v9  ;;  %v336_v25 = vmul.f32 0.6931472, %v479_v31  ;;  %v242_v45 = vmul.f32 1.442695, %v211_v58  ;;  %v91_v37 = vld [vmem:[#allocation5 + $0x38] sm:$0xff]  ;;  %v97_v58 = vld [vmem:[#allocation5 + $0x68] sm:$0xff] }
  0x4b   :  { %v405_v40 = vadd.f32 %v404_v15, %v392_v19  ;;  %v354_v21 = vmul.f32 0.6931472, %v481_v30  ;;  %v375_v4 = vmul.f32 %v693_v56, %v374_v61  ;;  %v396_v49 = vadd.f32 %v324_v17, %v660_v5  ;;  %v483_v48 = vpop.eup %482 }
  0x4c   :  { %494 = vpow2.f32 %v234_v27  ;;  %v342_v18 = vsel %vm719_vm5, %v339_v60, %v336_v25  ;;  %vm747_vm7 = vcmp.lt.f32.partialorder %v376_v44, 0.0004427343  ;;  %v103_v54 = vmul.f32 0.9, %v87_v32  ;;  %v99_v44 = vld [vmem:[#allocation5 + $0x78] sm:$0xff] }
  0x4d   :  { %v406_v26 = vadd.f32 %v405_v40, %v394_v1  ;;  %v360_v28 = vsel %vm724_vm6, %v357_v13, %v354_v21  ;;  %v372_v56 = vmul.f32 0.6931472, %v483_v48  ;;  %v398_v5 = vadd.f32 %v342_v18, %v664_v20 }
  0x4e   :  { %496 = vpow2.f32 %v238_v16  ;;  %v400_v41 = vadd.f32 %v360_v28, %v666_v7  ;;  %v105_v59 = vmul.f32 0.9, %v89_v50  ;;  %v107_v62 = vmul.f32 0.9, %v91_v37 }
  0x4f   :  { %v407_v29 = vadd.f32 %v406_v26, %v396_v49  ;;  %498 = vpow2.f32 %v242_v45  ;;  %v378_v60 = vsel %vm747_vm7, %v375_v4, %v372_v56  ;;  %v109_v63 = vmul.f32 0.9, %v93_v51 }
  0x50   :  { %v402_v55 = vadd.f32 %v378_v60, %v687_v52  ;;  %v111_v35 = vmul.f32 0.9, %v95_v36  ;;  %v113_v39 = vmul.f32 0.9, %v97_v58  ;;  %v115_v20 = vmul.f32 0.9, %v99_v44 }
  0x51   :  { %v408_v8 = vadd.f32 %v407_v29, %v398_v5  ;;  %v117_v7 = vadd.f32 0.05, %v672_v24  ;;  %v119_v11 = vadd.f32 0.05, %v103_v54  ;;  %v121_v14 = vadd.f32 0.05, %v105_v59 }
  0x52   :  { %v758_v42 = vpop.eup %484  ;;  %v123_v47 = vadd.f32 0.05, %v107_v62  ;;  %v125_v43 = vadd.f32 0.05, %v109_v63  ;;  %v133_v0 = vmax.f32 %v650_v2, 0.0  ;;  %v135_v15 = vmax.f32 %v652_v3, 0.0 }
  0x53   :  { %v409_v10 = vadd.f32 %v408_v8, %v400_v41  ;;  %v761_v46 = vpop.eup %486  ;;  %v253_v53 = vadd.f32 1.0, %v758_v42  ;;  %v127_v19 = vadd.f32 0.05, %v111_v35  ;;  %v129_v27 = vadd.f32 0.05, %v113_v39 }
  0x54   :  { %v765_v52 = vpop.eup %488  ;;  %v271_v57 = vadd.f32 1.0, %v761_v46  ;;  %v131_v24 = vadd.f32 0.05, %v115_v20  ;;  %v137_v1 = vmax.f32 %v662_v6, 0.0  ;;  %v139_v32 = vmax.f32 %v668_v22, 0.0 }
  0x55   :  { %v410_v61 = vadd.f32 %v409_v10, %v402_v55  ;;  %500 = vlog2.f32 %v253_v53  ;;  %v289_v31 = vadd.f32 1.0, %v765_v52  ;;  %v141_v16 = vmax.f32 %v670_v23, 0.0 }
  0x56   :  { %v768_v9 = vpop.eup %490  ;;  %502 = vlog2.f32 %v271_v57  ;;  %v143_v30 = vmax.f32 %v676_v33, 0.0  ;;  %v145_v17 = vmax.f32 %v678_v34, 0.0  ;;  %v147_v40 = vmax.f32 %v701_v12, 0.0 }
  0x57   :  { %v772_v13 = vpop.eup %492  ;;  %504 = vlog2.f32 %v289_v31  ;;  %424 = vst [vmem:[#allocation7] sm:$0xff] %v410_v61  ;;  %v149_v45 = vmul.f32 %v117_v7, %v650_v2  ;;  %v151_v21 = vmul.f32 %v119_v11, %v652_v3  ;;  %v307_v4 = vadd.f32 1.0, %v768_v9 }
  0x58   :  { %v153_v49 = vmul.f32 %v121_v14, %v662_v6  ;;  %v155_v50 = vmul.f32 %v123_v47, %v668_v22  ;;  %v256_v48 = vmul.f32 -0.5, %v758_v42  ;;  %v325_v18 = vadd.f32 1.0, %v772_v13 }
  0x59   :  { %v779_v25 = vpop.eup %494  ;;  %v157_v26 = vmul.f32 %v125_v43, %v670_v23  ;;  %v159_v37 = vmul.f32 %v127_v19, %v676_v33  ;;  %v274_v2 = vmul.f32 -0.5, %v761_v46  ;;  %506 = vlog2.f32 %v307_v4 }
  0x5a   :  { %v797_v51 = vmul.f32 %v129_v27, %v678_v34  ;;  %v292_v6 = vmul.f32 -0.5, %v765_v52  ;;  %508 = vlog2.f32 %v325_v18  ;;  %v343_v22 = vadd.f32 1.0, %v779_v25 }
  0x5b   :  { %v789_v38 = vpop.eup %496  ;;  %v802_v54 = vmul.f32 %v131_v24, %v701_v12  ;;  %v165_v28 = vsub.f32 %v133_v0, %v149_v45  ;;  %v167_v23 = vsub.f32 %v135_v15, %v151_v21  ;;  %v259_v33 = vand.u32 2147483647, %v758_v42 }
  0x5c   :  { %v794_v3 = vpop.eup %498  ;;  %v257_v56 = vadd.f32 1.0, %v256_v48  ;;  %v310_v5 = vmul.f32 -0.5, %v768_v9  ;;  %510 = vlog2.f32 %v343_v22  ;;  %v361_v36 = vadd.f32 1.0, %v789_v38 }
  0x5d   :  { %v275_v58 = vadd.f32 1.0, %v274_v2  ;;  %v277_v41 = vand.u32 2147483647, %v761_v46  ;;  %v295_v29 = vand.u32 2147483647, %v765_v52  ;;  %v379_v44 = vadd.f32 1.0, %v794_v3 }
  0x5e   :  { %v169_v59 = vsub.f32 %v137_v1, %v153_v49  ;;  %v293_v60 = vadd.f32 1.0, %v292_v6  ;;  %v328_v62 = vmul.f32 -0.5, %v772_v13  ;;  %512 = vlog2.f32 %v361_v36 }
  0x5f   :  { %v171_v63 = vsub.f32 %v139_v32, %v155_v50  ;;  %v173_v55 = vsub.f32 %v141_v16, %v157_v26  ;;  %v313_v8 = vand.u32 2147483647, %v768_v9  ;;  %514 = vlog2.f32 %v379_v44 }
  0x60   :  { %v258_v35 = vmul.f32 %v758_v42, %v257_v56  ;;  %vm813_vm8 = vcmp.lt.f32.partialorder %v259_v33, 0.0004427343  ;;  %v311_v20 = vadd.f32 1.0, %v310_v5  ;;  %v346_v10 = vmul.f32 -0.5, %v779_v25 }
  0x61   :  { %v276_v11 = vmul.f32 %v761_v46, %v275_v58  ;;  %vm819_vm9 = vcmp.lt.f32.partialorder %v277_v41, 0.0004427343  ;;  %vm823_vm10 = vcmp.lt.f32.partialorder %v295_v29, 0.0004427343  ;;  %v364_v42 = vmul.f32 -0.5, %v789_v38 }
  0x62   :  { %v501_v7 = vpop.eup %500  ;;  %v294_v53 = vmul.f32 %v765_v52, %v293_v60  ;;  %v329_v61 = vadd.f32 1.0, %v328_v62  ;;  %v331_v19 = vand.u32 2147483647, %v772_v13  ;;  %v175_v57 = vsub.f32 %v143_v30, %v159_v37 }
  0x63   :  { %v503_v43 = vpop.eup %502  ;;  %v255_v0 = vmul.f32 0.6931472, %v501_v7  ;;  %vm830_vm11 = vcmp.lt.f32.partialorder %v313_v8, 0.0004427343  ;;  %v382_v15 = vmul.f32 -0.5, %v794_v3  ;;  %v312_v32 = vmul.f32 %v768_v9, %v311_v20 }
  0x64   :  { %v505_v27 = vpop.eup %504  ;;  %v273_v46 = vmul.f32 0.6931472, %v503_v43  ;;  %v347_v16 = vadd.f32 1.0, %v346_v10  ;;  %v349_v45 = vand.u32 2147483647, %v779_v25  ;;  %v365_v30 = vadd.f32 1.0, %v364_v42 }
  0x65   :  { %v261_v31 = vsel %vm813_vm8, %v258_v35, %v255_v0  ;;  %v291_v1 = vmul.f32 0.6931472, %v505_v27  ;;  %v330_v50 = vmul.f32 %v772_v13, %v329_v61  ;;  %vm844_vm12 = vcmp.lt.f32.partialorder %v331_v19, 0.0004427343 }
  0x66   :  { %v279_v52 = vsel %vm819_vm9, %v276_v11, %v273_v46  ;;  %v389_v21 = vadd.f32 %v261_v31, %v165_v28  ;;  %v507_v4 = vpop.eup %506  ;;  %v367_v37 = vand.u32 2147483647, %v789_v38  ;;  %v383_v2 = vadd.f32 1.0, %v382_v15 }
  0x67   :  { %v297_v49 = vsel %vm823_vm10, %v294_v53, %v291_v1  ;;  %v391_v18 = vadd.f32 %v279_v52, %v167_v23  ;;  %v509_v9 = vpop.eup %508  ;;  %v309_v26 = vmul.f32 0.6931472, %v507_v4  ;;  %v348_v28 = vmul.f32 %v779_v25, %v347_v16 }
  0x68   :  { %v393_v6 = vadd.f32 %v297_v49, %v169_v59  ;;  %v327_v22 = vmul.f32 0.6931472, %v509_v9  ;;  %v385_v33 = vand.u32 2147483647, %v794_v3  ;;  %v177_v13 = vsub.f32 %v145_v17, %v797_v51 }
  0x69   :  { %v411_v56 = vadd.f32 %v391_v18, %v389_v21  ;;  %v511_v5 = vpop.eup %510  ;;  %v315_v23 = vsel %vm830_vm11, %v312_v32, %v309_v26  ;;  %vm856_vm13 = vcmp.lt.f32.partialorder %v349_v45, 0.0004427343  ;;  %v366_v58 = vmul.f32 %v789_v38, %v365_v30 }
  0x6a   :  { %v333_v25 = vsel %vm844_vm12, %v330_v50, %v327_v22  ;;  %v345_v41 = vmul.f32 0.6931472, %v511_v5  ;;  %v395_v29 = vadd.f32 %v315_v23, %v171_v63  ;;  %v179_v34 = vsub.f32 %v147_v40, %v802_v54 }
  0x6b   :  { %v412_v44 = vadd.f32 %v411_v56, %v393_v6  ;;  %v513_v59 = vpop.eup %512  ;;  %vm368_vm14 = vcmp.lt.f32.partialorder %v367_v37, 0.0004427343  ;;  %v384_v17 = vmul.f32 %v794_v3, %v383_v2  ;;  %v397_v51 = vadd.f32 %v333_v25, %v173_v55 }
  0x6c   :  { %v515_v60 = vpop.eup %514  ;;  %v351_v62 = vsel %vm856_vm13, %v348_v28, %v345_v41  ;;  %v363_v38 = vmul.f32 0.6931472, %v513_v59  ;;  %vm386_vm15 = vcmp.lt.f32.partialorder %v385_v33, 0.0004427343 }
  0x6d   :  { %v413_v8 = vadd.f32 %v412_v44, %v395_v29  ;;  %v381_v35 = vmul.f32 0.6931472, %v515_v60  ;;  %v399_v39 = vadd.f32 %v351_v62, %v175_v57 }
  0x6e   :  { %v369_v63 = vsel %vm368_vm14, %v366_v58, %v363_v38 }
  0x6f   :  { %v414_v20 = vadd.f32 %v413_v8, %v397_v51  ;;  %v387_v10 = vsel %vm386_vm15, %v384_v17, %v381_v35  ;;  %v401_v7 = vadd.f32 %v369_v63, %v177_v13 }
  0x70   :  { %v403_v11 = vadd.f32 %v387_v10, %v179_v34 }
  0x71   :  { %v415_v12 = vadd.f32 %v414_v20, %v399_v39 }
  0x73   :  { %v416_v40 = vadd.f32 %v415_v12, %v401_v7 }
  0x75   :  { %v417_v3 = vadd.f32 %v416_v40, %v403_v11 }
  0x77   :  { %425 = vst [vmem:[#allocation7 + $0x8] sm:$0xff] %v417_v3 }
  0x78   :  { %567 = shalt.err (!%p564_p0)
}
  0x79   :  { %435 = dma.vmem_to_hbm [thread:$0]  %s433_s1, 256, %s874_s2, [#allocation4]  }
  0x7a   :  { %580 = dma.done.wait [#allocation4], 256  }
  0x7b   :  { %581 = vsyncadd [#allocation4], 4294967040 }
  0x7c   :  { %439 = vsyncpa [#allocation3], 1 }
  0x7d   :  { %440 = vsyncpa [#allocation6], 1 }
  0x7e   :  { %441 = vsyncpa [#allocation4], 1 }

</bundles_post_ra>
